<compile_context>
chip_gen: v7x
topology: tpu7x:2x2x1
jax: 0.10.0
libtpu: 0.0.40
codegen_flags: <defaults>
</compile_context>

<pallas_src>
import functools

import jax
import jax.numpy as jnp
from jax.experimental import pallas as pl
from jax.experimental.pallas import tpu as pltpu


# ---------------------------------------------------------------------------
# kernels
# ---------------------------------------------------------------------------

def _seg_sum_kernel(batch_ref, h_ref, out_ref, acc_ref, *, n_nodes, tile_n,
                    ragged):
    """Accumulate out[g, d] += sum_n (batch[n] == g) * h[n, d] over node tiles."""
    i = pl.program_id(1)  # node-block index (reduction axis, innermost)

    @pl.when(i == 0)
    def _():
        acc_ref[...] = jnp.zeros_like(acc_ref)

    b = batch_ref[...]          # (1, tile_n) int32, lane-major
    h = h_ref[...]              # (tile_n, tile_d) native dtype
    num_graphs = out_ref.shape[0]

    if ragged:
        # Last node block reads past the true node count: zero those h rows so
        # any garbage (even NaN) contributes exactly 0 regardless of the
        # (also-garbage) batch ids in that range.
        row = i * tile_n + jax.lax.broadcasted_iota(jnp.int32, (tile_n, 1), 0)
        h = jnp.where(row < n_nodes, h, jnp.zeros_like(h))

    # One-hot membership mask already in (graphs, nodes) orientation; 0/1 is
    # exact in any float dtype, so keep it in h's dtype to feed the MXU at
    # full rate (bf16 on v6e/v7x).
    iota_g = jax.lax.broadcasted_iota(jnp.int32, (num_graphs, tile_n), 0)
    mask = (b == iota_g).astype(h.dtype)               # (num_graphs, tile_n)

    acc_ref[...] += jax.lax.dot_general(
        mask, h, (((1,), (0,)), ((), ())),
        preferred_element_type=jnp.float32,
    )

    out_ref[...] = acc_ref[...].astype(out_ref.dtype)


def _sum_kernel(h_ref, out_ref, acc_ref, *, n_nodes, tile_n, ragged):
    """Single-graph pooling: out[0, d] += sum_n h[n, d] over node tiles."""
    i = pl.program_id(1)

    @pl.when(i == 0)
    def _():
        acc_ref[...] = jnp.zeros_like(acc_ref)

    h = h_ref[...].astype(jnp.float32)
    if ragged:
        row = i * tile_n + jax.lax.broadcasted_iota(jnp.int32, (tile_n, 1), 0)
        h = jnp.where(row < n_nodes, h, 0.0)

    acc_ref[...] += jnp.sum(h, axis=0, keepdims=True)
    out_ref[...] = acc_ref[...].astype(out_ref.dtype)


# ---------------------------------------------------------------------------
# tiling helpers
# ---------------------------------------------------------------------------

_H_TILE_BUDGET_BYTES = 8 * 1024 * 1024   # double-buffered h tile budget
_VMEM_LIMIT_BYTES = 32 * 1024 * 1024     # safe on v5e/v6e/v7x


def _choose_tile_d(d):
    for cand in (512, 256, 128):
        if d % cand == 0:
            return cand
    return d  # full extent (allowed for any d)


def _choose_tile_n(n, tile_d, itemsize):
    max_rows = _H_TILE_BUDGET_BYTES // (2 * tile_d * itemsize)
    tile_n = min(2048, max_rows)
    tile_n = max(128, (tile_n // 128) * 128)  # lane-dense batch loads
    if n <= tile_n:
        return n  # single node block == full extent (no divisibility needed)
    return tile_n


# ---------------------------------------------------------------------------
# wrappers
# ---------------------------------------------------------------------------

def segment_sum_pallas(h_atm, x_atm_batch, num_graphs, *, tile_n=None):
    """Scatter-sum pooling over graphs: returns [num_graphs, node_dim]."""
    n, d = h_atm.shape
    tile_d = _choose_tile_d(d)
    if tile_n is None:
        tile_n = _choose_tile_n(n, tile_d, h_atm.dtype.itemsize)
    ragged = (n % tile_n) != 0
    grid = (d // tile_d, pl.cdiv(n, tile_n))  # (feature parallel, node reduce)

    batch_row = x_atm_batch.astype(jnp.int32).reshape(1, n)  # lane-major ids

    kernel = functools.partial(
        _seg_sum_kernel, n_nodes=n, tile_n=tile_n, ragged=ragged)

    return pl.pallas_call(
        kernel,
        out_shape=jax.ShapeDtypeStruct((num_graphs, d), h_atm.dtype),
        grid_spec=pltpu.PrefetchScalarGridSpec(
            num_scalar_prefetch=0,
            grid=grid,
            in_specs=[
                pl.BlockSpec((1, tile_n), lambda j, i: (0, i)),
                pl.BlockSpec((tile_n, tile_d), lambda j, i: (i, j)),
            ],
            out_specs=pl.BlockSpec((num_graphs, tile_d), lambda j, i: (0, j)),
            scratch_shapes=[pltpu.VMEM((num_graphs, tile_d), jnp.float32)],
        ),
        compiler_params=pltpu.CompilerParams(
            dimension_semantics=("parallel", "arbitrary"),
            vmem_limit_bytes=_VMEM_LIMIT_BYTES,
        ),
    )(batch_row, h_atm)


def sum_pool_pallas(h_atm, *, tile_n=None):
    """Single-graph pooling: returns [node_dim]."""
    n, d = h_atm.shape
    tile_d = _choose_tile_d(d)
    if tile_n is None:
        tile_n = _choose_tile_n(n, tile_d, h_atm.dtype.itemsize)
    ragged = (n % tile_n) != 0
    grid = (d // tile_d, pl.cdiv(n, tile_n))

    kernel = functools.partial(
        _sum_kernel, n_nodes=n, tile_n=tile_n, ragged=ragged)

    out = pl.pallas_call(
        kernel,
        out_shape=jax.ShapeDtypeStruct((1, d), h_atm.dtype),
        grid_spec=pltpu.PrefetchScalarGridSpec(
            num_scalar_prefetch=0,
            grid=grid,
            in_specs=[pl.BlockSpec((tile_n, tile_d), lambda j, i: (i, j))],
            out_specs=pl.BlockSpec((1, tile_d), lambda j, i: (0, j)),
            scratch_shapes=[pltpu.VMEM((1, tile_d), jnp.float32)],
        ),
        compiler_params=pltpu.CompilerParams(
            dimension_semantics=("parallel", "arbitrary"),
            vmem_limit_bytes=_VMEM_LIMIT_BYTES,
        ),
    )(h_atm)
    return out[0]


class DecoderPallas:
    """Pallas port of the PyTorch Decoder module (no learned parameters)."""

    def __init__(self, node_dim, out_dim):
        self.node_dim = node_dim
        self.out_dim = out_dim

    def __call__(self, h_atm, x_atm_batch, num_graphs):
        if num_graphs != 1:
            return segment_sum_pallas(h_atm, x_atm_batch, num_graphs)
        # single-graph case: plain sum over nodes -> [node_dim]
        return sum_pool_pallas(h_atm)


# ---------------------------------------------------------------------------
# self-test
# ---------------------------------------------------------------------------

if __name__ == "__main__":
    key = jax.random.PRNGKey(0)
    node_dim = 32
    n_nodes = 16
    num_graphs = 2

    k1, k2 = jax.random.split(key)
    h_atm = jax.random.normal(k1, (n_nodes, node_dim), dtype=jnp.float32)
    # deterministic batch assignment: first half graph 0, second half graph 1
    x_atm_batch = jnp.concatenate(
        [jnp.zeros((n_nodes // 2,), jnp.int32),
         jnp.ones((n_nodes - n_nodes // 2,), jnp.int32)]
    )

    dec = DecoderPallas(node_dim=node_dim, out_dim=node_dim)

    # multi-graph path
    out_multi = jax.block_until_ready(dec(h_atm, x_atm_batch, num_graphs))
    ref_multi = jax.ops.segment_sum(h_atm, x_atm_batch, num_segments=num_graphs)
    assert out_multi.shape == (num_graphs, node_dim)
    assert jnp.allclose(out_multi, ref_multi, atol=1e-5, rtol=1e-5)

    # single-graph path
    out_single = jax.block_until_ready(dec(h_atm, x_atm_batch, 1))
    ref_single = h_atm.sum(axis=0)
    assert out_single.shape == (node_dim,)
    assert jnp.allclose(out_single, ref_single, atol=1e-5, rtol=1e-5)

    # ragged node-tiling path (last block reads past n; must be masked in-kernel)
    n2, g2 = 300, 3
    h2 = jax.random.normal(k2, (n2, node_dim), dtype=jnp.float32)
    b2 = jax.random.randint(jax.random.PRNGKey(1), (n2,), 0, g2, dtype=jnp.int32)
    out2 = jax.block_until_ready(segment_sum_pallas(h2, b2, g2, tile_n=128))
    ref2 = jax.ops.segment_sum(h2, b2, num_segments=g2)
    assert jnp.allclose(out2, ref2, atol=1e-4, rtol=1e-4)

    print("KERNEL_OK")
</pallas_src>

<mosaic_0001>
module attributes {stable_mosaic.version = 11 : i64} {
  func.func @_seg_sum_kernel(%arg0: i32, %arg1: i32, %arg2: memref<1x16xi32, #tpu.memory_space<vmem>>, %arg3: memref<16x32xf32, #tpu.memory_space<vmem>>, %arg4: memref<2x32xf32, #tpu.memory_space<vmem>>, %arg5: memref<2x32xf32, #tpu.memory_space<vmem>>) attributes {dimension_semantics = [#tpu.dimension_semantics<parallel>, #tpu.dimension_semantics<arbitrary>], iteration_bounds = array<i64: 1, 1>, scalar_prefetch = 0 : i64, scratch_operands = 1 : i64, tpu.core_type = #tpu.core_type<tc>, window_params = [{transform_indices = @transform_0, window_bounds = array<i64: 1, 16>}, {transform_indices = @transform_1, window_bounds = array<i64: 16, 32>}, {transform_indices = @transform_2, window_bounds = array<i64: 2, 32>}]} {
    %c0_i32 = arith.constant 0 : i32
    %0 = arith.cmpi eq, %arg1, %c0_i32 : i32
    %1 = arith.extui %0 : i1 to i32
    %c0_i32_0 = arith.constant 0 : i32
    %2 = arith.cmpi ne, %1, %c0_i32_0 : i32
    scf.if %2 {
      %cst_12 = arith.constant 0.000000e+00 : f32
      %16 = vector.broadcast %cst_12 : f32 to vector<2x32xf32>
      %c0_13 = arith.constant 0 : index
      %c0_14 = arith.constant 0 : index
      %17 = vector.load %arg5[%c0_13, %c0_14] : memref<2x32xf32, #tpu.memory_space<vmem>>, vector<2x32xf32>
      tpu.vector_store %arg5[%c0_13, %c0_14], %16 {strides = array<i32>} : memref<2x32xf32, #tpu.memory_space<vmem>>, vector<2x32xf32>,
    } else {
    }
    %c0 = arith.constant 0 : index
    %c0_1 = arith.constant 0 : index
    %3 = vector.load %arg2[%c0, %c0_1] : memref<1x16xi32, #tpu.memory_space<vmem>>, vector<1x16xi32>
    %c0_2 = arith.constant 0 : index
    %c0_3 = arith.constant 0 : index
    %4 = vector.load %arg3[%c0_2, %c0_3] : memref<16x32xf32, #tpu.memory_space<vmem>>, vector<16x32xf32>
    %5 = tpu.iota {dimensions = array<i32: 0>} : vector<2x16xi32>
    %6 = vector.broadcast %3 : vector<1x16xi32> to vector<2x16xi32>
    %7 = arith.cmpi eq, %6, %5 : vector<2x16xi32>
    %8 = arith.extui %7 : vector<2x16xi1> to vector<2x16xi32>
    %9 = arith.sitofp %8 : vector<2x16xi32> to vector<2x16xf32>
    %c0_4 = arith.constant 0 : index
    %c0_5 = arith.constant 0 : index
    %10 = vector.load %arg5[%c0_4, %c0_5] : memref<2x32xf32, #tpu.memory_space<vmem>>, vector<2x32xf32>
    %cst = arith.constant dense<0.000000e+00> : vector<2x32xf32>
    %11 = tpu.matmul %9, %4, %cst {dimension_numbers = #tpu.dot_dimension_numbers<[1], [0], [0], [1], [0, 0, 1, 1], [], []>} : vector<2x16xf32>, vector<16x32xf32>, vector<2x32xf32> -> vector<2x32xf32>
    %12 = arith.addf %10, %11 : vector<2x32xf32>
    %c0_6 = arith.constant 0 : index
    %c0_7 = arith.constant 0 : index
    %13 = vector.load %arg5[%c0_6, %c0_7] : memref<2x32xf32, #tpu.memory_space<vmem>>, vector<2x32xf32>
    tpu.vector_store %arg5[%c0_6, %c0_7], %12 {strides = array<i32>} : memref<2x32xf32, #tpu.memory_space<vmem>>, vector<2x32xf32>,
    %c0_8 = arith.constant 0 : index
    %c0_9 = arith.constant 0 : index
    %14 = vector.load %arg5[%c0_8, %c0_9] : memref<2x32xf32, #tpu.memory_space<vmem>>, vector<2x32xf32>
    %c0_10 = arith.constant 0 : index
    %c0_11 = arith.constant 0 : index
    %15 = vector.load %arg4[%c0_10, %c0_11] : memref<2x32xf32, #tpu.memory_space<vmem>>, vector<2x32xf32>
    tpu.vector_store %arg4[%c0_10, %c0_11], %14 {strides = array<i32>} : memref<2x32xf32, #tpu.memory_space<vmem>>, vector<2x32xf32>,
    return
  }
  func.func @transform_0(%arg0: i32, %arg1: i32) -> (i32, i32) {
    %c0_i32 = arith.constant 0 : i32
    %c0_i32_0 = arith.constant 0 : i32
    return %c0_i32, %arg1 : i32, i32
  }
  func.func @transform_1(%arg0: i32, %arg1: i32) -> (i32, i32) {
    %c0_i32 = arith.constant 0 : i32
    return %arg1, %arg0 : i32, i32
  }
  func.func @transform_2(%arg0: i32, %arg1: i32) -> (i32, i32) {
    %c0_i32 = arith.constant 0 : i32
    %c0_i32_0 = arith.constant 0 : i32
    return %c0_i32, %arg0 : i32, i32
  }
}

</mosaic_0001>

<bundles_post_ra>
// kernel: tpu_custom_call.1
= control target key start
LH: loop header
LB: loop body
LE: loop exit
PB: predicated region body
PF: predicated region fallthrough
CT: control target
= control target key end

     0   :  { %7 = vsyncpa [#allocation4], 0  ;;  %s317_s0 = inlined_call_operand.hbm [shape: s32[1,16], index: 0, kind: input, shape index: {}]   ;;  %s318_s1 = inlined_call_operand.hbm [shape: f32[16,32], index: 1, kind: input, shape index: {}]   ;;  %s319_s2 = inlined_call_operand.hbm [shape: f32[2,32], index: 2, kind: output, shape index: {}]  }
   0x1   :  { %8 = vsyncpa [#allocation7], 0 }
   0x2   :  { %9 = vsyncpa [#allocation5], 0  ;;  %s248_s9 = smov [#allocation3]   ;;  %s249_s11 = smov [#allocation6]  }
   0x3   :  { %s16_s10 = sshll.u32 %s248_s9, 4  ;;  %s25_s12 = sshll.u32 %s249_s11, 4  ;;  %s17_s10 = int_to_ptr.vmem [resolvable:$true] %s16_s10  ;;  %s271_s12 = int_to_ptr.vmem [resolvable:$true] %s25_s12 }
   0x4   :  { %s176_s15 = scalar_lea.hbm %s317_s0, 16 }
   0x5   :  { %p177_p0 = scmp.ne.s32.totalorder %s317_s0, %s176_s15  ;;  %p180_p1 = scmp.lt.u32.totalorder %s176_s15, %s317_s0 }
   0x7   :  { %p182_p2 = pnand %p180_p1, %p177_p0 }
   0x9   :  { %185 = shalt.err (!%p182_p2)
}
   0xa   :  { %s186_s20 = scalar_lea.vmem %s17_s10, 16  ;;  %s190_s21 = scalar_lea.vmem %s17_s10, 32 }
   0xb   :  { %p187_p3 = scmp.ne.s32.totalorder %s17_s10, %s186_s20  ;;  %p191_p4 = scmp.lt.s32.totalorder %s17_s10, %s17_s10 }
   0xc   :  { %p192_p5 = scmp.lt.s32.totalorder %s190_s21, %s186_s20 }
   0xe   :  { %p193_p6 = por %p192_p5, %p191_p4 }
  0x10   :  { %p194_p7 = pnand %p193_p6, %p187_p3 }
  0x12   :  { %197 = shalt.err (!%p194_p7)
}
  0x13   :  { %19 = dma.hbm_to_vmem [thread:$0]  %s317_s0, 16, %s17_s10, [#allocation4]  }
  0x14   :  { %s198_s26 = scalar_lea.hbm %s318_s1, 256 }
  0x15   :  { %p199_p8 = scmp.ne.s32.totalorder %s318_s1, %s198_s26  ;;  %p202_p9 = scmp.lt.u32.totalorder %s198_s26, %s318_s1 }
  0x17   :  { %p204_p10 = pnand %p202_p9, %p199_p8 }
  0x19   :  { %207 = shalt.err (!%p204_p10)
}
  0x1a   :  { %s208_s3 = scalar_lea.vmem %s271_s12, 256  ;;  %p213_p12 = scmp.lt.s32.totalorder %s271_s12, %s271_s12 }
  0x1b   :  { %p209_p11 = scmp.ne.s32.totalorder %s271_s12, %s208_s3  ;;  %p214_p13 = scmp.lt.s32.totalorder %s208_s3, %s208_s3 }
  0x1d   :  { %p215_p0 = por %p214_p13, %p213_p12 }
  0x1f   :  { %p216_p1 = pnand %p215_p0, %p209_p11 }
  0x21   :  { %219 = shalt.err (!%p216_p1)
}
  0x22   :  { %s250_s0 = smov 128   ;;  %s251_s4 = smov 8  }
  0x23   :  { %31 = dma.hbm_to_vmem [thread:$0]  %s318_s1, 256, %s271_s12, [#allocation7], %s250_s0, %s250_s0, %s251_s4  }
  0x24   :  { %242 = dma.done.wait [#allocation4], 16  }
  0x25   :  { %243 = vsyncadd [#allocation4], 4294967280 }
  0x26   :  { %244 = dma.done.wait [#allocation7], 256  }
  0x27   :  { %245 = vsyncadd [#allocation7], 4294967040  ;;  %vm42_vm0 = vcmask 254976   ;;  %v252_v0 = vmov 0.0|0.0   ;;  %v253_v1 = vmov 0.0   ;;  %vm254_vm1 = vmmov 0  }
  0x28   :  { %165 = vmatprep.subr.bf16.mxu0 %v252_v0  ;;  %43 = vst.msk [vmem:[#allocation2] sm:$0x3] %vm42_vm0, %v253_v1  ;;  %162 = vmatprep.mubr.msk.f32.mxu0 %vm254_vm1, %v253_v1  ;;  %v47_v2 = vlaneseq  ;;  %v45_v4 = vld [vmem:[#allocation6] sm:$0xff]  ;;  %v46_v5 = vld [vmem:[#allocation6 + $0x8] sm:$0xff]  ;;  %v152_v6 = vld [vmem:[#allocation3] ss:$0 sm:$0xff] }
  0x29   :  { %v166_v7 = vpack.c.bf16 %v46_v5, %v45_v4  ;;  %vm57_vm3 = vcmask 130048   ;;  %s255_s1 = smov [#allocation8]  }
  0x2a   :  { %v48_v3 = vshrl.u32 %v47_v2, 7  ;;  %s142_s7 = sshll.u32 %s255_s1, 4  ;;  %s143_s7 = int_to_ptr.vmem [resolvable:$true] %s142_s7 }
  0x2b   :  { %167 = vmatpush3.bf16.msra.mxu0 %v166_v7  ;;  %s220_s8 = scalar_lea.vmem %s143_s7, 32  ;;  %p225_p3 = scmp.lt.s32.totalorder %s143_s7, %s143_s7 }
  0x2c   :  { %vm53_vm2 = vcmp.eq.s32.totalorder %v152_v6, %v48_v3  ;;  %p221_p2 = scmp.ne.s32.totalorder %s143_s7, %s220_s8  ;;  %p226_p4 = scmp.lt.s32.totalorder %s220_s8, %s220_s8 }
  0x2d   :  { %v153_v8 = vsel %vm53_vm2, 1.0, %v253_v1 }
  0x2e   :  { %163 = vmatmul.mubr.msk.f32.vlgmr.msra.gmra.mrb[0].mxu0 %vm57_vm3, %v153_v8  ;;  %p227_p5 = por %p226_p4, %p225_p3 }
  0x2f   :  { %v56_v9 = vld [vmem:[#allocation2] sm:$0x3] }
  0x30   :  { %p228_p6 = pnand %p227_p5, %p221_p2 }
 0x101   :  { %v127_v10 = vpop.f32.mrb[0].mxu0 }
 0x102   :  { %v131_v11 = vadd.f32 %v127_v10, %v56_v9  ;;  %v164_v12 = vpop.f32.mrb[1].mxu0 }
 0x104   :  { %133 = vst.msk [vmem:[#allocation2] sm:$0x3] %vm42_vm0, %v131_v11 }
 0x10b   :  { %v134_v13 = vld [vmem:[#allocation2] sm:$0x3] }
 0x10c   :  { %135 = vst.msk [vmem:[#allocation8] sm:$0x3] %vm42_vm0, %v134_v13 }
 0x10d   :  { %231 = shalt.err (!%p228_p6)
}
 0x10e   :  { %s232_s11 = scalar_lea.hbm %s319_s2, 32 }
 0x10f   :  { %p233_p7 = scmp.ne.s32.totalorder %s319_s2, %s232_s11  ;;  %p236_p8 = scmp.lt.u32.totalorder %s232_s11, %s319_s2 }
 0x111   :  { %p238_p9 = pnand %p236_p8, %p233_p7 }
 0x113   :  { %241 = shalt.err (!%p238_p9)
}
 0x114   :  { %145 = dma.vmem_to_hbm [thread:$0]  %s143_s7, 32, %s319_s2, [#allocation5]  }
 0x115   :  { %246 = dma.done.wait [#allocation5], 32  }
 0x116   :  { %247 = vsyncadd [#allocation5], 4294967264 }
 0x117   :  { %149 = vsyncpa [#allocation4], 1 }
 0x118   :  { %150 = vsyncpa [#allocation7], 1 }
 0x119   :  { %151 = vsyncpa [#allocation5], 1 }

</bundles_post_ra>
